<compile_context>
chip_gen: v7x
topology: tpu7x:2x2x1
jax: 0.10.0
libtpu: 0.0.40
codegen_flags: <defaults>
</compile_context>

<pallas_src>
import jax
import jax.numpy as jnp
from jax.experimental import pallas as pl
from jax.experimental.pallas import tpu as pltpu

LANE = 128
SUBLANE = 8


def _round_up(x, m):
    return ((x + m - 1) // m) * m


def _make_policy_kernel(n_hidden):
    """Kernel signature: (obs, w1, b1, ..., wN, bN, w_out, b_out, out)."""

    def kernel(*refs):
        obs_ref = refs[0]
        out_ref = refs[-1]
        p = refs[1:-1]                       # w1,b1, w2,b2, ..., w_out,b_out
        h = obs_ref[...]
        for li in range(n_hidden):
            w = p[2 * li][...]
            b = p[2 * li + 1][...]
            h = jnp.tanh(jnp.dot(h, w, preferred_element_type=jnp.float32) + b)
        wo = p[2 * n_hidden][...]
        bo = p[2 * n_hidden + 1][...]
        out_ref[...] = jnp.dot(h, wo, preferred_element_type=jnp.float32) + bo

    return kernel


def prepare_kernel_params(params, raw_obs_dim):
    """One-time param prep: fold obs-norm (and obs zero-pad) into layer 1,
    then zero-pad all layer widths to 128 lanes (exact)."""
    mean = params["obs_norm_mean"].astype(jnp.float32)      # (1, obs_dim)
    std = params["obs_norm_std"].astype(jnp.float32)        # (1, obs_dim)
    hidden = [(w.astype(jnp.float32), b.astype(jnp.float32))
              for (w, b) in params["hidden"]]
    wo = params["w_out"].astype(jnp.float32)
    bo = params["b_out"].astype(jnp.float32)

    obs_dim = mean.shape[-1]
    inv_std = 1.0 / (std + 1e-6)                             # divide once, here
    d_eff = min(raw_obs_dim, obs_dim)

    # Fold normalization into the first affine layer (exact algebra):
    #   ((obs_p - mean) * inv_std) @ W1 + b1
    #     = obs_p @ (diag(inv_std) @ W1) + (b1 - (mean * inv_std) @ W1)
    # obs_p has zeros beyond d_eff (pad branch), so those rows of the scaled
    # W1 never contribute and can be dropped; their -mean*inv_std term is
    # already captured in the folded bias.
    w1, b1 = hidden[0]
    w1_eff = (w1 * inv_std[0][:, None])[:d_eff, :]           # (d_eff, H1)
    b1_eff = b1 - (mean * inv_std) @ w1                      # (1, H1)
    hidden = [(w1_eff, b1_eff)] + hidden[1:]

    # Lane-dense padding of every layer width to a multiple of 128.
    def pad2(a, rows, cols):
        return jnp.pad(a, ((0, rows - a.shape[0]), (0, cols - a.shape[1])))

    act_dim = wo.shape[1]
    layers = []           # flat [w1,b1, w2,b2, ..., w_out,b_out], padded
    in_rows = d_eff
    for (w, b) in hidden:
        h_out = w.shape[1]
        h_out_p = _round_up(h_out, LANE)
        layers.append(pad2(w, in_rows, h_out_p))
        layers.append(pad2(b, 1, h_out_p))
        in_rows = h_out_p
    out_p = _round_up(act_dim, LANE)
    layers.append(pad2(wo, in_rows, out_p))
    layers.append(pad2(bo, 1, out_p))

    return {
        "layers": layers,
        "n_hidden": len(hidden),
        "act_dim": act_dim,
        "d_eff": d_eff,
    }


def loaded_gaussian_policy_forward(obs, kparams, tb=None):
    """Pallas forward. obs: (B, D_raw). Returns (B, act_dim) float32."""
    layers = kparams["layers"]
    n_hidden = kparams["n_hidden"]
    act_dim = kparams["act_dim"]
    d_eff = kparams["d_eff"]

    B = obs.shape[0]
    # Truncate branch handled here; pad branch is folded into the first bias.
    obs = obs[:, :d_eff].astype(jnp.float32)

    # Batch tile: multiple of 8 sublanes, large enough to amortize the
    # ~0.35us/step overhead, capped (working set is tiny vs VMEM anyway).
    if tb is None:
        tb = min(1024, _round_up(max(B, 1), SUBLANE))
    tb = _round_up(tb, SUBLANE)
    b_pad = _round_up(B, tb)
    if b_pad != B:
        obs = jnp.pad(obs, ((0, b_pad - B), (0, 0)))

    out_p = layers[-1].shape[1]
    grid = (b_pad // tb,)

    def resident(shape):
        # whole-array block, same tile every grid step -> stays VMEM-resident
        return pl.BlockSpec(shape, lambda i: (0, 0))

    in_specs = [pl.BlockSpec((tb, d_eff), lambda i: (i, 0))]   # obs: batch-tiled
    in_specs += [resident(a.shape) for a in layers]

    # Cost estimate (padded dims; matmul flops + tanh transcendentals).
    flops = 0
    trans = 0
    for li in range(n_hidden + 1):
        w = layers[2 * li]
        flops += 2 * b_pad * w.shape[0] * w.shape[1]
        if li < n_hidden:
            trans += b_pad * w.shape[1]
    param_bytes = 4 * sum(int(a.size) for a in layers)
    cost = pl.CostEstimate(
        flops=flops,
        transcendentals=trans,
        bytes_accessed=4 * b_pad * (d_eff + out_p) + param_bytes,
    )

    out = pl.pallas_call(
        _make_policy_kernel(n_hidden),
        out_shape=jax.ShapeDtypeStruct((b_pad, out_p), jnp.float32),
        grid=grid,
        in_specs=in_specs,
        out_specs=pl.BlockSpec((tb, out_p), lambda i: (i, 0)),
        compiler_params=pltpu.CompilerParams(
            dimension_semantics=("parallel",),   # megacore sharding on v7x
        ),
        cost_estimate=cost,
    )(obs, *layers)

    return out[:B, :act_dim]


def make_params(key, obs_dim=16, hidden=(64, 64), act_dim=8):
    """Deterministic synthetic parameters matching the module's structure."""
    n_layers = len(hidden) + 1
    ks = jax.random.split(key, 2 + 2 * n_layers)
    obsnorm_mean = jax.random.normal(ks[0], (1, obs_dim), jnp.float32) * 0.1
    obsnorm_meansq = jnp.square(obsnorm_mean) + jax.random.uniform(
        ks[1], (1, obs_dim), jnp.float32, 0.5, 1.5)
    obsnorm_std = jnp.sqrt(jnp.maximum(0.0, obsnorm_meansq - jnp.square(obsnorm_mean)))

    def init_layer(kw, kb, d_in, d_out):
        w = jax.random.normal(kw, (d_in, d_out), jnp.float32) / jnp.sqrt(float(d_in))
        b = jax.random.normal(kb, (1, d_out), jnp.float32) * 0.01
        return w, b

    dims = [obs_dim] + list(hidden)
    hidden_layers = []
    for li in range(len(hidden)):
        w, b = init_layer(ks[2 + 2 * li], ks[3 + 2 * li], dims[li], dims[li + 1])
        hidden_layers.append((w, b))
    wo, bo = init_layer(ks[2 + 2 * len(hidden)], ks[3 + 2 * len(hidden)],
                        dims[-1], act_dim)

    return {
        "obs_norm_mean": obsnorm_mean,
        "obs_norm_std": obsnorm_std,
        "hidden": hidden_layers,
        "w_out": wo, "b_out": bo,
    }


def reference_forward(obs, params):
    """Pure-JAX reference (mirrors the PyTorch forward)."""
    mean, std = params["obs_norm_mean"], params["obs_norm_std"]
    obs_dim = mean.shape[-1]
    n_pad = obs_dim - obs.shape[-1]
    if n_pad > 0:
        obs = jnp.pad(obs, ((0, 0), (0, n_pad)))
    elif n_pad < 0:
        obs = obs[:, :obs_dim]
    h = (obs - mean) / (std + 1e-6)
    for (w, b) in params["hidden"]:
        h = jnp.tanh(h @ w + b)
    return h @ params["w_out"] + params["b_out"]


if __name__ == "__main__":
    key = jax.random.PRNGKey(0)
    k_obs, k_obs2, k_params = jax.random.split(key, 3)

    params = make_params(k_params, obs_dim=16, hidden=(64, 64), act_dim=8)

    # Case 1: raw obs dim (11) < obs_dim (16) -> pad branch (folded into b1)
    B, raw = 2, 11
    obs = jax.random.normal(k_obs, (B, raw), jnp.float32)
    kparams = prepare_kernel_params(params, raw_obs_dim=raw)
    out = jax.block_until_ready(loaded_gaussian_policy_forward(obs, kparams))
    ref = reference_forward(obs, params)
    assert out.shape == (B, 8)
    assert jnp.allclose(out, ref, atol=1e-4, rtol=1e-4), "mismatch vs reference (pad case)"

    # Case 2: raw obs dim (20) > obs_dim (16) -> truncate branch, multi-tile grid
    B2, raw2 = 200, 20
    obs2 = jax.random.normal(k_obs2, (B2, raw2), jnp.float32)
    kparams2 = prepare_kernel_params(params, raw_obs_dim=raw2)
    out2 = jax.block_until_ready(
        loaded_gaussian_policy_forward(obs2, kparams2, tb=64))
    ref2 = reference_forward(obs2, params)
    assert out2.shape == (B2, 8)
    assert jnp.allclose(out2, ref2, atol=1e-4, rtol=1e-4), "mismatch vs reference (trunc case)"

    # TODO(synk): pickle file loading / ptu numpy conversion from the original
    # module is host-side glue and intentionally not part of the kernel.
    print("KERNEL_OK")
</pallas_src>

<mosaic_0001>
module attributes {stable_mosaic.version = 11 : i64} {
  func.func @kernel(%arg0: i32, %arg1: memref<8x11xf32, #tpu.memory_space<vmem>>, %arg2: memref<11x128xf32, #tpu.memory_space<vmem>>, %arg3: memref<1x128xf32, #tpu.memory_space<vmem>>, %arg4: memref<128x128xf32, #tpu.memory_space<vmem>>, %arg5: memref<1x128xf32, #tpu.memory_space<vmem>>, %arg6: memref<128x128xf32, #tpu.memory_space<vmem>>, %arg7: memref<1x128xf32, #tpu.memory_space<vmem>>, %arg8: memref<8x128xf32, #tpu.memory_space<vmem>>) attributes {dimension_semantics = [#tpu.dimension_semantics<parallel>], iteration_bounds = array<i64: 1>, scalar_prefetch = 0 : i64, scratch_operands = 0 : i64, tpu.core_type = #tpu.core_type<tc>, window_params = [{transform_indices = @transform_0, window_bounds = array<i64: 8, 11>}, {pipeline_mode = #tpu.pipeline_mode<synchronous>, transform_indices = @transform_1, window_bounds = array<i64: 11, 128>}, {pipeline_mode = #tpu.pipeline_mode<synchronous>, transform_indices = @transform_2, window_bounds = array<i64: 1, 128>}, {pipeline_mode = #tpu.pipeline_mode<synchronous>, transform_indices = @transform_3, window_bounds = array<i64: 128, 128>}, {pipeline_mode = #tpu.pipeline_mode<synchronous>, transform_indices = @transform_4, window_bounds = array<i64: 1, 128>}, {pipeline_mode = #tpu.pipeline_mode<synchronous>, transform_indices = @transform_5, window_bounds = array<i64: 128, 128>}, {pipeline_mode = #tpu.pipeline_mode<synchronous>, transform_indices = @transform_6, window_bounds = array<i64: 1, 128>}, {transform_indices = @transform_7, window_bounds = array<i64: 8, 128>}]} {
    %c0 = arith.constant 0 : index
    %c0_0 = arith.constant 0 : index
    %0 = vector.load %arg1[%c0, %c0_0] : memref<8x11xf32, #tpu.memory_space<vmem>>, vector<8x11xf32>
    %c0_1 = arith.constant 0 : index
    %c0_2 = arith.constant 0 : index
    %1 = vector.load %arg2[%c0_1, %c0_2] : memref<11x128xf32, #tpu.memory_space<vmem>>, vector<11x128xf32>
    %c0_3 = arith.constant 0 : index
    %c0_4 = arith.constant 0 : index
    %2 = vector.load %arg3[%c0_3, %c0_4] : memref<1x128xf32, #tpu.memory_space<vmem>>, vector<1x128xf32>
    %cst = arith.constant dense<0.000000e+00> : vector<8x128xf32>
    %3 = tpu.matmul %0, %1, %cst {dimension_numbers = #tpu.dot_dimension_numbers<[1], [0], [0], [1], [0, 0, 1, 1], [], []>} : vector<8x11xf32>, vector<11x128xf32>, vector<8x128xf32> -> vector<8x128xf32>
    %4 = vector.broadcast %2 : vector<1x128xf32> to vector<8x128xf32>
    %5 = arith.addf %3, %4 : vector<8x128xf32>
    %6 = math.tanh %5 : vector<8x128xf32>
    %c0_5 = arith.constant 0 : index
    %c0_6 = arith.constant 0 : index
    %7 = vector.load %arg4[%c0_5, %c0_6] : memref<128x128xf32, #tpu.memory_space<vmem>>, vector<128x128xf32>
    %c0_7 = arith.constant 0 : index
    %c0_8 = arith.constant 0 : index
    %8 = vector.load %arg5[%c0_7, %c0_8] : memref<1x128xf32, #tpu.memory_space<vmem>>, vector<1x128xf32>
    %cst_9 = arith.constant dense<0.000000e+00> : vector<8x128xf32>
    %9 = tpu.matmul %6, %7, %cst_9 {dimension_numbers = #tpu.dot_dimension_numbers<[1], [0], [0], [1], [0, 0, 1, 1], [], []>} : vector<8x128xf32>, vector<128x128xf32>, vector<8x128xf32> -> vector<8x128xf32>
    %10 = vector.broadcast %8 : vector<1x128xf32> to vector<8x128xf32>
    %11 = arith.addf %9, %10 : vector<8x128xf32>
    %12 = math.tanh %11 : vector<8x128xf32>
    %c0_10 = arith.constant 0 : index
    %c0_11 = arith.constant 0 : index
    %13 = vector.load %arg6[%c0_10, %c0_11] : memref<128x128xf32, #tpu.memory_space<vmem>>, vector<128x128xf32>
    %c0_12 = arith.constant 0 : index
    %c0_13 = arith.constant 0 : index
    %14 = vector.load %arg7[%c0_12, %c0_13] : memref<1x128xf32, #tpu.memory_space<vmem>>, vector<1x128xf32>
    %cst_14 = arith.constant dense<0.000000e+00> : vector<8x128xf32>
    %15 = tpu.matmul %12, %13, %cst_14 {dimension_numbers = #tpu.dot_dimension_numbers<[1], [0], [0], [1], [0, 0, 1, 1], [], []>} : vector<8x128xf32>, vector<128x128xf32>, vector<8x128xf32> -> vector<8x128xf32>
    %16 = vector.broadcast %14 : vector<1x128xf32> to vector<8x128xf32>
    %17 = arith.addf %15, %16 : vector<8x128xf32>
    %c0_15 = arith.constant 0 : index
    %c0_16 = arith.constant 0 : index
    %18 = vector.load %arg8[%c0_15, %c0_16] : memref<8x128xf32, #tpu.memory_space<vmem>>, vector<8x128xf32>
    tpu.vector_store %arg8[%c0_15, %c0_16], %17 {strides = array<i32>} : memref<8x128xf32, #tpu.memory_space<vmem>>, vector<8x128xf32>,
    return
  }
  func.func @transform_0(%arg0: i32) -> (i32, i32) {
    %c0_i32 = arith.constant 0 : i32
    %c0_i32_0 = arith.constant 0 : i32
    return %arg0, %c0_i32 : i32, i32
  }
  func.func @transform_1(%arg0: i32) -> (i32, i32) {
    %c0_i32 = arith.constant 0 : i32
    %c0_i32_0 = arith.constant 0 : i32
    %c0_i32_1 = arith.constant 0 : i32
    return %c0_i32, %c0_i32_0 : i32, i32
  }
  func.func @transform_2(%arg0: i32) -> (i32, i32) {
    %c0_i32 = arith.constant 0 : i32
    %c0_i32_0 = arith.constant 0 : i32
    %c0_i32_1 = arith.constant 0 : i32
    return %c0_i32, %c0_i32_0 : i32, i32
  }
  func.func @transform_3(%arg0: i32) -> (i32, i32) {
    %c0_i32 = arith.constant 0 : i32
    %c0_i32_0 = arith.constant 0 : i32
    %c0_i32_1 = arith.constant 0 : i32
    return %c0_i32, %c0_i32_0 : i32, i32
  }
  func.func @transform_4(%arg0: i32) -> (i32, i32) {
    %c0_i32 = arith.constant 0 : i32
    %c0_i32_0 = arith.constant 0 : i32
    %c0_i32_1 = arith.constant 0 : i32
    return %c0_i32, %c0_i32_0 : i32, i32
  }
  func.func @transform_5(%arg0: i32) -> (i32, i32) {
    %c0_i32 = arith.constant 0 : i32
    %c0_i32_0 = arith.constant 0 : i32
    %c0_i32_1 = arith.constant 0 : i32
    return %c0_i32, %c0_i32_0 : i32, i32
  }
  func.func @transform_6(%arg0: i32) -> (i32, i32) {
    %c0_i32 = arith.constant 0 : i32
    %c0_i32_0 = arith.constant 0 : i32
    %c0_i32_1 = arith.constant 0 : i32
    return %c0_i32, %c0_i32_0 : i32, i32
  }
  func.func @transform_7(%arg0: i32) -> (i32, i32) {
    %c0_i32 = arith.constant 0 : i32
    %c0_i32_0 = arith.constant 0 : i32
    return %arg0, %c0_i32 : i32, i32
  }
}

</mosaic_0001>

<bundles_post_ra>
// kernel: tpu_custom_call.1
= control target key start
LH: loop header
LB: loop body
LE: loop exit
PB: predicated region body
PF: predicated region fallthrough
CT: control target
= control target key end

     0   :  { %12 = vsyncpa [#allocation3], 0  ;;  %s827_s0 = inlined_call_operand.hbm [shape: f32[8,11], index: 0, kind: input, shape index: {}]   ;;  %s828_s1 = inlined_call_operand.hbm [shape: f32[11,128], index: 1, kind: input, shape index: {}]   ;;  %s829_s2 = inlined_call_operand.vmem [shape: f32[1,128], index: 2, kind: input, shape index: {}]   ;;  %s830_s3 = inlined_call_operand.hbm [shape: f32[128,128], index: 3, kind: input, shape index: {}]   ;;  %s831_s4 = inlined_call_operand.vmem [shape: f32[1,128], index: 4, kind: input, shape index: {}]   ;;  %s832_s5 = inlined_call_operand.hbm [shape: f32[128,128], index: 5, kind: input, shape index: {}]   ;;  %s833_s6 = inlined_call_operand.vmem [shape: f32[1,128], index: 6, kind: input, shape index: {}]   ;;  %s834_s7 = inlined_call_operand.hbm [shape: f32[8,128], index: 7, kind: output, shape index: {}]  }
   0x1   :  { %13 = vsyncpa [#allocation6], 0 }
   0x2   :  { %14 = vsyncpa [#allocation9], 0 }
   0x3   :  { %15 = vsyncpa [#allocation4], 0  ;;  %s678_s24 = smov [#allocation5]   ;;  %s560_s28 = scalar_lea.hbm %s828_s1, 256 }
   0x4   :  { %s31_s25 = sshll.u32 %s678_s24, 4  ;;  %p561_p0 = scmp.ne.s32.totalorder %s828_s1, %s560_s28  ;;  %s32_s25 = int_to_ptr.vmem [resolvable:$true] %s31_s25 }
   0x5   :  { %p564_p1 = scmp.lt.u32.totalorder %s560_s28, %s828_s1 }
   0x7   :  { %p566_p2 = pnand %p564_p1, %p561_p0 }
   0x9   :  { %569 = shalt.err (!%p566_p2)
}
   0xa   :  { %s570_s10 = scalar_lea.vmem %s32_s25, 256  ;;  %p575_p4 = scmp.lt.s32.totalorder %s32_s25, %s32_s25 }
   0xb   :  { %p571_p3 = scmp.ne.s32.totalorder %s32_s25, %s570_s10  ;;  %p576_p5 = scmp.lt.s32.totalorder %s570_s10, %s570_s10 }
   0xd   :  { %p577_p6 = por %p576_p5, %p575_p4 }
   0xf   :  { %p578_p7 = pnand %p577_p6, %p571_p3 }
  0x11   :  { %581 = shalt.err (!%p578_p7)
}
  0x12   :  { %s679_s11 = smov 128   ;;  %s680_s12 = smov 8  }
  0x13   :  { %37 = dma.hbm_to_vmem [thread:$0]  %s828_s1, 256, %s32_s25, [#allocation6], %s679_s11, %s679_s11, %s680_s12  }
  0x14   :  { %s681_s15 = smov [#allocation2]   ;;  %s682_s17 = smov [#allocation7]  }
  0x15   :  { %s22_s16 = sshll.u32 %s681_s15, 4  ;;  %s45_s18 = sshll.u32 %s682_s17, 4  ;;  %s23_s16 = int_to_ptr.vmem [resolvable:$true] %s22_s16  ;;  %s46_s18 = int_to_ptr.vmem [resolvable:$true] %s45_s18 }
  0x16   :  { %s582_s21 = scalar_lea.hbm %s827_s0, 128 }
  0x17   :  { %p583_p8 = scmp.ne.s32.totalorder %s827_s0, %s582_s21  ;;  %p586_p9 = scmp.lt.u32.totalorder %s582_s21, %s827_s0 }
  0x19   :  { %p588_p10 = pnand %p586_p9, %p583_p8 }
  0x1b   :  { %591 = shalt.err (!%p588_p10)
}
  0x1c   :  { %s592_s1 = scalar_lea.vmem %s23_s16, 128  ;;  %p597_p12 = scmp.lt.s32.totalorder %s23_s16, %s23_s16 }
  0x1d   :  { %p593_p11 = scmp.ne.s32.totalorder %s23_s16, %s592_s1  ;;  %p598_p13 = scmp.lt.s32.totalorder %s592_s1, %s592_s1 }
  0x1f   :  { %p599_p0 = por %p598_p13, %p597_p12 }
  0x21   :  { %p600_p1 = pnand %p599_p0, %p593_p11 }
  0x23   :  { %603 = shalt.err (!%p600_p1)
}
  0x24   :  { %25 = dma.hbm_to_vmem [thread:$0]  %s827_s0, 128, %s23_s16, [#allocation3]  }
  0x25   :  { %s604_s30 = scalar_lea.hbm %s830_s3, 2048 }
  0x26   :  { %p605_p2 = scmp.ne.s32.totalorder %s830_s3, %s604_s30  ;;  %p608_p3 = scmp.lt.u32.totalorder %s604_s30, %s830_s3 }
  0x28   :  { %p610_p4 = pnand %p608_p3, %p605_p2 }
  0x2a   :  { %613 = shalt.err (!%p610_p4)
}
  0x2b   :  { %s614_s14 = scalar_lea.vmem %s46_s18, 2048  ;;  %p619_p6 = scmp.lt.s32.totalorder %s46_s18, %s46_s18 }
  0x2c   :  { %p615_p5 = scmp.ne.s32.totalorder %s46_s18, %s614_s14  ;;  %p620_p7 = scmp.lt.s32.totalorder %s614_s14, %s614_s14 }
  0x2e   :  { %p621_p8 = por %p620_p7, %p619_p6 }
  0x30   :  { %p622_p9 = pnand %p621_p8, %p615_p5 }
  0x32   :  { %625 = shalt.err (!%p622_p9)
}
  0x33   :  { %51 = dma.hbm_to_vmem [thread:$0]  %s830_s3, 2048, %s46_s18, [#allocation6], %s679_s11, %s679_s11, %s680_s12  }
  0x34   :  { %s683_s16 = smov [#allocation8]   ;;  %s626_s21 = scalar_lea.hbm %s832_s5, 2048 }
  0x35   :  { %s59_s17 = sshll.u32 %s683_s16, 4  ;;  %p627_p10 = scmp.ne.s32.totalorder %s832_s5, %s626_s21  ;;  %s60_s17 = int_to_ptr.vmem [resolvable:$true] %s59_s17 }
  0x36   :  { %p630_p11 = scmp.lt.u32.totalorder %s626_s21, %s832_s5 }
  0x38   :  { %p632_p12 = pnand %p630_p11, %p627_p10 }
  0x3a   :  { %635 = shalt.err (!%p632_p12)
}
  0x3b   :  { %s636_s1 = scalar_lea.vmem %s60_s17, 2048  ;;  %p641_p0 = scmp.lt.s32.totalorder %s60_s17, %s60_s17 }
  0x3c   :  { %p637_p13 = scmp.ne.s32.totalorder %s60_s17, %s636_s1  ;;  %p642_p1 = scmp.lt.s32.totalorder %s636_s1, %s636_s1 }
  0x3e   :  { %p643_p2 = por %p642_p1, %p641_p0 }
  0x40   :  { %p644_p3 = pnand %p643_p2, %p637_p13 }
  0x42   :  { %647 = shalt.err (!%p644_p3)
}
  0x43   :  { %65 = dma.hbm_to_vmem [thread:$0]  %s832_s5, 2048, %s60_s17, [#allocation9], %s679_s11, %s679_s11, %s680_s12  }
  0x44   :  { %670 = dma.done.wait [#allocation3], 128  }
  0x45   :  { %671 = vsyncadd [#allocation3], 4294967168 }
  0x46   :  { %672 = dma.done.wait [#allocation6], 2304  }
  0x47   :  { %673 = vsyncadd [#allocation6], 4294964992 }
  0x48   :  { %674 = dma.done.wait [#allocation9], 2048  }
  0x49   :  { %675 = vsyncadd [#allocation9], 4294965248  ;;  %v684_v0 = vmov 0.0|0.0   ;;  %vm685_vm0 = vmmov 0   ;;  %v686_v1 = vmov 0.0   ;;  %vm94_vm1 = vcmask 1042432  }
  0x4a   :  { %493 = vmatprep.subr.bf16.mxu0 %v684_v0  ;;  %497 = vmatprep.subr.bf16.mxu1 %v684_v0  ;;  %v81_v2 = vld [vmem:[#allocation5] sm:$0xff]  ;;  %v82_v3 = vld [vmem:[#allocation5 + $0x8] sm:$0x7]  ;;  %vm687_vm2 = vmmov 1   ;;  %v169_v5 = vld [vmem:[#allocation7] sm:$0xff]  ;;  %vm90_vm4 = vcmask 89088  }
  0x4b   :  { %420 = vmatprep.mubr.msk.f32.mxu0 %vm685_vm0, %v686_v1  ;;  %455 = vmatprep.mubr.msk.f32.mxu1 %vm685_vm0, %v686_v1  ;;  %vm495_vm3 = vmpackc.low %vm94_vm1, %vm687_vm2  ;;  %v494_v4 = vpack.c.bf16 %v82_v3, %v81_v2  ;;  %v170_v6 = vld [vmem:[#allocation7 + $0x8] sm:$0xff]  ;;  %v171_v7 = vld [vmem:[#allocation7 + $0x10] sm:$0xff]  ;;  %s688_s28 = smov [#allocation10]  }
  0x4c   :  { %v498_v8 = vpack.c.bf16 %v170_v6, %v169_v5  ;;  %v172_v9 = vld [vmem:[#allocation7 + $0x18] sm:$0xff]  ;;  %v80_v10 = vld [vmem:[#allocation2] sm:$0xff]  ;;  %v173_v12 = vld [vmem:[#allocation7 + $0x20] sm:$0xff]  ;;  %s363_s29 = sshll.u32 %s688_s28, 4  ;;  %s364_s29 = int_to_ptr.vmem [resolvable:$true] %s363_s29 }
  0x4d   :  { %496 = vmatpush3.bf16.msk.msra.mxu0 %vm495_vm3, %v494_v4  ;;  %v501_v11 = vpack.c.bf16 %v172_v9, %v171_v7  ;;  %v174_v13 = vld [vmem:[#allocation7 + $0x28] sm:$0xff]  ;;  %v175_v15 = vld [vmem:[#allocation7 + $0x30] sm:$0xff]  ;;  %v176_v16 = vld [vmem:[#allocation7 + $0x38] sm:$0xff]  ;;  %s648_s30 = scalar_lea.vmem %s364_s29, 128  ;;  %p653_p5 = scmp.lt.s32.totalorder %s364_s29, %s364_s29 }
  0x4e   :  { %499 = vmatpush3.bf16.msra.mxu1 %v498_v8  ;;  %521 = vmatprep.subr.bf16.mxu0 %v684_v0  ;;  %v504_v14 = vpack.c.bf16 %v174_v13, %v173_v12  ;;  %v507_v17 = vpack.c.bf16 %v176_v16, %v175_v15  ;;  %v177_v18 = vld [vmem:[#allocation7 + $0x40] sm:$0xff]  ;;  %v178_v19 = vld [vmem:[#allocation7 + $0x48] sm:$0xff]  ;;  %v179_v21 = vld [vmem:[#allocation7 + $0x50] sm:$0xff]  ;;  %p649_p4 = scmp.ne.s32.totalorder %s364_s29, %s648_s30  ;;  %p654_p6 = scmp.lt.s32.totalorder %s648_s30, %s648_s30 }
  0x4f   :  { %500 = vmatprep.subr.bf16.mxu1 %v684_v0  ;;  %v510_v20 = vpack.c.bf16 %v178_v19, %v177_v18  ;;  %v180_v22 = vld [vmem:[#allocation7 + $0x58] sm:$0xff]  ;;  %v181_v24 = vld [vmem:[#allocation7 + $0x60] sm:$0xff]  ;;  %v182_v25 = vld [vmem:[#allocation7 + $0x68] sm:$0xff] }
  0x50   :  { %421 = vmatmul.mubr.msk.f32.vlgmr.msra.gmra.mrb[0].mxu0 %vm90_vm4, %v80_v10  ;;  %v513_v23 = vpack.c.bf16 %v180_v22, %v179_v21  ;;  %v516_v26 = vpack.c.bf16 %v182_v25, %v181_v24  ;;  %v183_v27 = vld [vmem:[#allocation7 + $0x70] sm:$0xff]  ;;  %v184_v28 = vld [vmem:[#allocation7 + $0x78] sm:$0xff]  ;;  %v263_v30 = vld [vmem:[#allocation8] sm:$0xff]  ;;  %p655_p7 = por %p654_p6, %p653_p5 }
  0x51   :  { %490 = vmatprep.mubr.msk.f32.mxu0 %vm685_vm0, %v686_v1  ;;  %v519_v29 = vpack.c.bf16 %v184_v28, %v183_v27  ;;  %v264_v31 = vld [vmem:[#allocation8 + $0x8] sm:$0xff]  ;;  %v265_v32 = vld [vmem:[#allocation8 + $0x10] sm:$0xff]  ;;  %v266_v34 = vld [vmem:[#allocation8 + $0x18] sm:$0xff] }
  0x52   :  { %502 = vmatpush3.bf16.msra.mxu1 %v501_v11  ;;  %v522_v33 = vpack.c.bf16 %v264_v31, %v263_v30  ;;  %v525_v35 = vpack.c.bf16 %v266_v34, %v265_v32  ;;  %v267_v36 = vld [vmem:[#allocation8 + $0x20] sm:$0xff]  ;;  %v268_v37 = vld [vmem:[#allocation8 + $0x28] sm:$0xff]  ;;  %v269_v39 = vld [vmem:[#allocation8 + $0x30] sm:$0xff]  ;;  %p656_p8 = pnand %p655_p7, %p649_p4 }
  0x53   :  { %503 = vmatprep.subr.bf16.mxu1 %v684_v0  ;;  %v528_v38 = vpack.c.bf16 %v268_v37, %v267_v36  ;;  %v270_v40 = vld [vmem:[#allocation8 + $0x38] sm:$0xff]  ;;  %v271_v42 = vld [vmem:[#allocation8 + $0x40] sm:$0xff]  ;;  %v272_v43 = vld [vmem:[#allocation8 + $0x48] sm:$0xff] }
  0x54   :  { %523 = vmatpush3.bf16.msra.mxu0 %v522_v33  ;;  %v531_v41 = vpack.c.bf16 %v270_v40, %v269_v39  ;;  %v534_v44 = vpack.c.bf16 %v272_v43, %v271_v42  ;;  %v374_v45 = vld [vmem:[%s829_s2] ss:$0 sm:$0xff]  ;;  %v273_v50 = vld [vmem:[#allocation8 + $0x50] sm:$0xff]  ;;  %v274_v51 = vld [vmem:[#allocation8 + $0x58] sm:$0xff] }
  0x55   :  { %524 = vmatprep.subr.bf16.mxu0 %v684_v0  ;;  %v537_v52 = vpack.c.bf16 %v274_v51, %v273_v50  ;;  %v275_v53 = vld [vmem:[#allocation8 + $0x60] sm:$0xff]  ;;  %v276_v54 = vld [vmem:[#allocation8 + $0x68] sm:$0xff]  ;;  %v277_v56 = vld [vmem:[#allocation8 + $0x70] sm:$0xff] }
  0x56   :  { %505 = vmatpush3.bf16.msra.mxu1 %v504_v14  ;;  %v540_v55 = vpack.c.bf16 %v276_v54, %v275_v53  ;;  %v278_v57 = vld [vmem:[#allocation8 + $0x78] sm:$0xff]  ;;  %v377_v59 = vld [vmem:[%s831_s4] ss:$0 sm:$0xff] }
  0x57   :  { %506 = vmatprep.subr.bf16.mxu1 %v684_v0  ;;  %v543_v58 = vpack.c.bf16 %v278_v57, %v277_v56  ;;  %v378_v1 = vld [vmem:[%s833_s6] ss:$0 sm:$0xff] }
  0x58   :  { %526 = vmatpush3.bf16.msra.mxu0 %v525_v35 }
  0x59   :  { %527 = vmatprep.subr.bf16.mxu0 %v684_v0 }
  0x5a   :  { %508 = vmatpush3.bf16.msra.mxu1 %v507_v17 }
  0x5b   :  { %509 = vmatprep.subr.bf16.mxu1 %v684_v0 }
  0x5c   :  { %529 = vmatpush3.bf16.msra.mxu0 %v528_v38 }
  0x5d   :  { %530 = vmatprep.subr.bf16.mxu0 %v684_v0 }
  0x5e   :  { %511 = vmatpush3.bf16.msra.mxu1 %v510_v20 }
  0x5f   :  { %512 = vmatprep.subr.bf16.mxu1 %v684_v0 }
  0x60   :  { %532 = vmatpush3.bf16.msra.mxu0 %v531_v41 }
  0x61   :  { %533 = vmatprep.subr.bf16.mxu0 %v684_v0 }
  0x62   :  { %514 = vmatpush3.bf16.msra.mxu1 %v513_v23 }
  0x63   :  { %515 = vmatprep.subr.bf16.mxu1 %v684_v0 }
  0x64   :  { %535 = vmatpush3.bf16.msra.mxu0 %v534_v44 }
  0x65   :  { %536 = vmatprep.subr.bf16.mxu0 %v684_v0 }
  0x66   :  { %517 = vmatpush3.bf16.msra.mxu1 %v516_v26 }
  0x67   :  { %518 = vmatprep.subr.bf16.mxu1 %v684_v0 }
  0x68   :  { %538 = vmatpush3.bf16.msra.mxu0 %v537_v52 }
  0x69   :  { %539 = vmatprep.subr.bf16.mxu0 %v684_v0 }
  0x6a   :  { %520 = vmatpush3.bf16.msra.mxu1 %v519_v29 }
  0x6c   :  { %541 = vmatpush3.bf16.msra.mxu0 %v540_v55 }
  0x6d   :  { %542 = vmatprep.subr.bf16.mxu0 %v684_v0 }
  0x70   :  { %544 = vmatpush3.bf16.msra.mxu0 %v543_v58 }
 0x123   :  { %v164_v46 = vpop.f32.mrb[0].mxu0 }
 0x124   :  { %v165_v47 = vadd.f32 %v374_v45, %v164_v46  ;;  %v422_v48 = vpop.f32.mrb[1].mxu0 }
 0x126   :  { %556 = vtanh.f32 %v165_v47 }
 0x130   :  { %v557_v49 = vpop.eup %556 }
 0x131   :  { %456 = vmatmul.mubr.f32.vlgmr.msra.gmra.mrb[0].mxu1 %v557_v49 }
 0x204   :  { %v258_v60 = vpop.f32.mrb[0].mxu1 }
 0x205   :  { %v259_v61 = vadd.f32 %v377_v59, %v258_v60  ;;  %v457_v62 = vpop.f32.mrb[1].mxu1 }
 0x207   :  { %558 = vtanh.f32 %v259_v61 }
 0x211   :  { %v559_v63 = vpop.eup %558 }
 0x212   :  { %491 = vmatmul.mubr.f32.vlgmr.msra.gmra.mrb[2].mxu0 %v559_v63 }
 0x2e5   :  { %v352_v2 = vpop.f32.mrb[2].mxu0 }
 0x2e6   :  { %v353_v3 = vadd.f32 %v378_v1, %v352_v2  ;;  %v492_v0 = vpop.f32.mrb[3].mxu0 }
 0x2e8   :  { %356 = vst [vmem:[#allocation10] sm:$0xff] %v353_v3 }
 0x2e9   :  { %659 = shalt.err (!%p656_p8)
}
 0x2ea   :  { %s660_s9 = scalar_lea.hbm %s834_s7, 128 }
 0x2eb   :  { %p661_p9 = scmp.ne.s32.totalorder %s834_s7, %s660_s9  ;;  %p664_p10 = scmp.lt.u32.totalorder %s660_s9, %s834_s7 }
 0x2ed   :  { %p666_p11 = pnand %p664_p10, %p661_p9 }
 0x2ef   :  { %669 = shalt.err (!%p666_p11)
}
 0x2f0   :  { %366 = dma.vmem_to_hbm [thread:$0]  %s364_s29, 128, %s834_s7, [#allocation4]  }
 0x2f1   :  { %676 = dma.done.wait [#allocation4], 128  }
 0x2f2   :  { %677 = vsyncadd [#allocation4], 4294967168 }
 0x2f3   :  { %370 = vsyncpa [#allocation3], 1 }
 0x2f4   :  { %371 = vsyncpa [#allocation6], 1 }
 0x2f5   :  { %372 = vsyncpa [#allocation9], 1 }
 0x2f6   :  { %373 = vsyncpa [#allocation4], 1 }

</bundles_post_ra>
